<compile_context>
chip_gen: v7x
topology: tpu7x:2x2x1
jax: 0.10.0
libtpu: 0.0.40
codegen_flags: <defaults>
</compile_context>

<pallas_src>
import functools

import jax
import jax.numpy as jnp
from jax.experimental import pallas as pl
from jax.experimental.pallas import tpu as pltpu


def _ap_generator_kernel(x_ref, w1_ref, b1_ref, w2_ref, b2_ref, w3_ref, b3_ref,
                         o_ref):
    """Fused 3-layer MLP on one batch tile.

    x_ref  : [bb, d_in]   natural (row-major) activation tile, streamed
    w*_ref : [out, in]    PyTorch nn.Linear layout, VMEM-resident
    b*_ref : [out, 1]     f32, broadcast across lanes
    o_ref  : [d_out, bb]  lane-dense (batch-on-lanes) output tile
    """
    w_dtype = w1_ref.dtype
    xb = x_ref[...].astype(w_dtype)            # no-op when dtypes already match

    # Layer 1: contract d_in of both operands -> [hid, bb].  The feature-major
    # re-orientation of the x tile happens here, in-kernel, instead of a
    # wrapper-side HBM round trip.
    h1 = jnp.einsum("hd,bd->hb", w1_ref[...], xb,
                    preferred_element_type=jnp.float32)
    h1 = jnp.maximum(h1 + b1_ref[...], 0.0)

    # Layer 2 (+ReLU): [hid, bb]
    h2 = jnp.dot(w2_ref[...], h1.astype(w_dtype),
                 preferred_element_type=jnp.float32)
    h2 = jnp.maximum(h2 + b2_ref[...], 0.0)

    # Layer 3 + output_fn (sigmoid): [d_out, bb]
    # (Micro-opt of turning this M=1 matmul into a VPU mul + sublane reduce is
    #  intentionally skipped until a bundle dump shows the MXU pop exposed.)
    z = jnp.dot(w3_ref[...], h2.astype(w_dtype),
                preferred_element_type=jnp.float32) + b3_ref[...]
    o_ref[...] = jax.nn.sigmoid(z).astype(o_ref.dtype)


def _round_up(v, m):
    return ((v + m - 1) // m) * m


def _pick_block_batch(B, d_in, d_out, hid, x_itemsize, w_itemsize, requested):
    """Batch-tile selection: large (overhead amortization), multiple of 256
    (lane-dense output stores), VMEM-budgeted, >=2 grid steps for v7x."""
    bb = max(256, _round_up(requested, 256))

    # v7x megacore: keep at least 2 grid steps when the batch is large enough
    # so the "parallel" axis can be sharded across both TensorCores.
    if B > 512:
        bb = min(bb, max(256, _round_up(pl.cdiv(B, 2), 256)))

    # VMEM budget: double-buffered x & out blocks + f32 h1/h2 temporaries +
    # resident weights.  12 MiB leaves headroom under v5e's 16 MiB scoped
    # default (and trivially under v6e/v7x 32 MiB defaults).
    budget = 12 * 1024 * 1024

    def vmem_bytes(b):
        return (2 * b * d_in * x_itemsize          # x input double-buffer
                + 2 * b * d_out * 4                # output double-buffer
                + 2 * hid * b * 4                  # h1 / h2 f32 temporaries
                + (hid * d_in + hid * hid + d_out * hid) * w_itemsize
                + (2 * hid + d_out) * 4)           # biases

    while bb > 256 and vmem_bytes(bb) > budget:
        bb -= 256

    # Small batches: one full-extent block (block dims == array dims, so the
    # (8,128) divisibility rule is satisfied by the "equals full dim" clause).
    if B <= bb:
        bb = B
    return bb


@functools.partial(jax.jit, static_argnames=("block_batch",))
def ap_generator_forward(x, params, block_batch=8192):
    """APGenerator forward.

    x: [B, input_dim] (f32 or bf16 -- feed bf16 to halve HBM traffic).
    params: weights [out, in] in the compute dtype (pre-cast once via
    prepare_params), biases [out, 1] f32.  Returns [B, output_dim] float32.
    """
    B, d_in = x.shape
    w1, w2, w3 = params["w1"], params["w2"], params["w3"]
    b1, b2, b3 = params["b1"], params["b2"], params["b3"]
    hid, d_out = w1.shape[0], w3.shape[0]

    bb = _pick_block_batch(B, d_in, d_out, hid,
                           jnp.dtype(x.dtype).itemsize,
                           jnp.dtype(w1.dtype).itemsize,
                           block_batch)
    n_blocks = pl.cdiv(B, bb)          # ragged last block handled by Pallas

    in_specs = [
        pl.BlockSpec((bb, d_in), lambda i: (i, 0)),    # x tile (streamed)
        pl.BlockSpec((hid, d_in), lambda i: (0, 0)),   # w1 (VMEM resident)
        pl.BlockSpec((hid, 1), lambda i: (0, 0)),      # b1
        pl.BlockSpec((hid, hid), lambda i: (0, 0)),    # w2
        pl.BlockSpec((hid, 1), lambda i: (0, 0)),      # b2
        pl.BlockSpec((d_out, hid), lambda i: (0, 0)),  # w3
        pl.BlockSpec((d_out, 1), lambda i: (0, 0)),    # b3
    ]
    out_spec = pl.BlockSpec((d_out, bb), lambda i: (0, i))

    out_t = pl.pallas_call(
        _ap_generator_kernel,
        out_shape=jax.ShapeDtypeStruct((d_out, B), jnp.float32),
        grid_spec=pl.GridSpec(
            grid=(n_blocks,),
            in_specs=in_specs,
            out_specs=out_spec,
        ),
        compiler_params=pltpu.CompilerParams(
            dimension_semantics=("parallel",)),
    )(x, w1, b1, w2, b2, w3, b3)

    # Output is tiny ([d_out, B]); this transpose is negligible vs the x stream.
    return out_t.T


def prepare_params(params, compute_dtype=jnp.bfloat16):
    """Pre-cast weights ONCE outside the per-call wrapper (no per-forward cast
    HLOs).  Biases stay f32 so the bias/ReLU/sigmoid epilogue is exact."""
    out = dict(params)
    for k in ("w1", "w2", "w3"):
        out[k] = params[k].astype(compute_dtype)
    return out


def init_params(key, input_dim, hidden_dim=32, output_dim=1):
    """nn.Linear-style U(-1/sqrt(fan_in), 1/sqrt(fan_in)); PyTorch layout.

    Weights [out_features, in_features]; biases [out_features, 1] (2-D so they
    broadcast across lanes inside the kernel)."""
    ks = jax.random.split(key, 6)

    def uniform(k, shape, fan_in):
        bound = 1.0 / jnp.sqrt(jnp.float32(fan_in))
        return jax.random.uniform(k, shape, jnp.float32, -bound, bound)

    return {
        "w1": uniform(ks[0], (hidden_dim, input_dim), input_dim),
        "b1": uniform(ks[1], (hidden_dim, 1), input_dim),
        "w2": uniform(ks[2], (hidden_dim, hidden_dim), hidden_dim),
        "b2": uniform(ks[3], (hidden_dim, 1), hidden_dim),
        "w3": uniform(ks[4], (output_dim, hidden_dim), hidden_dim),
        "b3": uniform(ks[5], (output_dim, 1), hidden_dim),
    }


def ap_generator_reference(x, params):
    """Pure-JAX reference of the PyTorch forward (output_fn = sigmoid)."""
    h1 = jnp.maximum(x @ params["w1"].T + params["b1"][:, 0], 0.0)
    h2 = jnp.maximum(h1 @ params["w2"].T + params["b2"][:, 0], 0.0)
    return jax.nn.sigmoid(h2 @ params["w3"].T + params["b3"][:, 0])


if __name__ == "__main__":
    key = jax.random.PRNGKey(0)
    k_param, k_x = jax.random.split(key)

    batch, input_dim, hidden_dim, output_dim = 16, 16, 32, 1
    params = init_params(k_param, input_dim, hidden_dim, output_dim)
    x = jax.random.normal(k_x, (batch, input_dim), jnp.float32)
    ref = ap_generator_reference(x, params)

    # f32 path: bit-faithful to the PyTorch module.
    out_f32 = jax.block_until_ready(ap_generator_forward(x, params))
    assert out_f32.shape == (batch, output_dim), out_f32.shape
    assert jnp.allclose(out_f32, ref, atol=1e-5, rtol=1e-5), "f32 mismatch"

    # Recommended production path: bf16 weights (pre-cast once) + bf16 x stream
    # (halves the dominant HBM term); accumulation / epilogue stay f32.
    params_bf16 = prepare_params(params, jnp.bfloat16)
    out_bf16 = jax.block_until_ready(
        ap_generator_forward(x.astype(jnp.bfloat16), params_bf16))
    assert out_bf16.shape == (batch, output_dim)
    assert jnp.allclose(out_bf16, ref, atol=3e-2, rtol=3e-2), "bf16 mismatch"

    # Ragged batch: exercises Pallas block masking (no wrapper pad/transpose).
    x_r = jax.random.normal(k_x, (300, input_dim), jnp.float32)
    out_r = jax.block_until_ready(ap_generator_forward(x_r, params))
    assert out_r.shape == (300, output_dim)
    assert jnp.allclose(out_r, ap_generator_reference(x_r, params),
                        atol=1e-5, rtol=1e-5), "ragged mismatch"

    print("KERNEL_OK")
</pallas_src>

<mosaic_0001>
module attributes {stable_mosaic.version = 11 : i64} {
  func.func @_ap_generator_kernel(%arg0: i32, %arg1: memref<16x16xf32, #tpu.memory_space<vmem>>, %arg2: memref<32x16xf32, #tpu.memory_space<vmem>>, %arg3: memref<32x1xf32, #tpu.memory_space<vmem>>, %arg4: memref<32x32xf32, #tpu.memory_space<vmem>>, %arg5: memref<32x1xf32, #tpu.memory_space<vmem>>, %arg6: memref<1x32xf32, #tpu.memory_space<vmem>>, %arg7: memref<1x1xf32, #tpu.memory_space<vmem>>, %arg8: memref<1x16xf32, #tpu.memory_space<vmem>>) attributes {dimension_semantics = [#tpu.dimension_semantics<parallel>], iteration_bounds = array<i64: 1>, scalar_prefetch = 0 : i64, scratch_operands = 0 : i64, tpu.core_type = #tpu.core_type<tc>, window_params = [{transform_indices = @transform_0, window_bounds = array<i64: 16, 16>}, {pipeline_mode = #tpu.pipeline_mode<synchronous>, transform_indices = @transform_1, window_bounds = array<i64: 32, 16>}, {pipeline_mode = #tpu.pipeline_mode<synchronous>, transform_indices = @transform_2, window_bounds = array<i64: 32, 1>}, {pipeline_mode = #tpu.pipeline_mode<synchronous>, transform_indices = @transform_3, window_bounds = array<i64: 32, 32>}, {pipeline_mode = #tpu.pipeline_mode<synchronous>, transform_indices = @transform_4, window_bounds = array<i64: 32, 1>}, {pipeline_mode = #tpu.pipeline_mode<synchronous>, transform_indices = @transform_5, window_bounds = array<i64: 1, 32>}, {pipeline_mode = #tpu.pipeline_mode<synchronous>, transform_indices = @transform_6, window_bounds = array<i64: 1, 1>}, {transform_indices = @transform_7, window_bounds = array<i64: 1, 16>}]} {
    %c0 = arith.constant 0 : index
    %c0_0 = arith.constant 0 : index
    %0 = vector.load %arg1[%c0, %c0_0] : memref<16x16xf32, #tpu.memory_space<vmem>>, vector<16x16xf32>
    %c0_1 = arith.constant 0 : index
    %c0_2 = arith.constant 0 : index
    %1 = vector.load %arg2[%c0_1, %c0_2] : memref<32x16xf32, #tpu.memory_space<vmem>>, vector<32x16xf32>
    "tpu.trace_start"() <{level = 10 : i32, message = "hd,bd->hb"}> : () -> ()
    %cst = arith.constant dense<0.000000e+00> : vector<32x16xf32>
    %2 = tpu.matmul %1, %0, %cst {dimension_numbers = #tpu.dot_dimension_numbers<[1], [1], [0], [0], [0, 0, 1, 0], [], []>} : vector<32x16xf32>, vector<16x16xf32>, vector<32x16xf32> -> vector<32x16xf32>
    "tpu.trace_stop"() : () -> ()
    %c0_3 = arith.constant 0 : index
    %c0_4 = arith.constant 0 : index
    %3 = vector.load %arg3[%c0_3, %c0_4] : memref<32x1xf32, #tpu.memory_space<vmem>>, vector<32x1xf32>
    %4 = vector.broadcast %3 : vector<32x1xf32> to vector<32x16xf32>
    %5 = arith.addf %2, %4 : vector<32x16xf32>
    %cst_5 = arith.constant 0.000000e+00 : f32
    %6 = vector.broadcast %cst_5 : f32 to vector<32x16xf32>
    %7 = arith.maximumf %5, %6 : vector<32x16xf32>
    %c0_6 = arith.constant 0 : index
    %c0_7 = arith.constant 0 : index
    %8 = vector.load %arg4[%c0_6, %c0_7] : memref<32x32xf32, #tpu.memory_space<vmem>>, vector<32x32xf32>
    %cst_8 = arith.constant dense<0.000000e+00> : vector<32x16xf32>
    %9 = tpu.matmul %8, %7, %cst_8 {dimension_numbers = #tpu.dot_dimension_numbers<[1], [0], [0], [1], [0, 0, 1, 1], [], []>} : vector<32x32xf32>, vector<32x16xf32>, vector<32x16xf32> -> vector<32x16xf32>
    %c0_9 = arith.constant 0 : index
    %c0_10 = arith.constant 0 : index
    %10 = vector.load %arg5[%c0_9, %c0_10] : memref<32x1xf32, #tpu.memory_space<vmem>>, vector<32x1xf32>
    %11 = vector.broadcast %10 : vector<32x1xf32> to vector<32x16xf32>
    %12 = arith.addf %9, %11 : vector<32x16xf32>
    %cst_11 = arith.constant 0.000000e+00 : f32
    %13 = vector.broadcast %cst_11 : f32 to vector<32x16xf32>
    %14 = arith.maximumf %12, %13 : vector<32x16xf32>
    %c0_12 = arith.constant 0 : index
    %c0_13 = arith.constant 0 : index
    %15 = vector.load %arg6[%c0_12, %c0_13] : memref<1x32xf32, #tpu.memory_space<vmem>>, vector<1x32xf32>
    %cst_14 = arith.constant dense<0.000000e+00> : vector<1x16xf32>
    %16 = tpu.matmul %15, %14, %cst_14 {dimension_numbers = #tpu.dot_dimension_numbers<[1], [0], [0], [1], [0, 0, 1, 1], [], []>} : vector<1x32xf32>, vector<32x16xf32>, vector<1x16xf32> -> vector<1x16xf32>
    %c0_15 = arith.constant 0 : index
    %c0_16 = arith.constant 0 : index
    %17 = vector.load %arg7[%c0_15, %c0_16] : memref<1x1xf32, #tpu.memory_space<vmem>>, vector<1x1xf32>
    %18 = vector.broadcast %17 : vector<1x1xf32> to vector<1x16xf32>
    %19 = arith.addf %16, %18 : vector<1x16xf32>
    %20 = arith.negf %19 : vector<1x16xf32>
    %21 = math.exp %20 : vector<1x16xf32>
    %cst_17 = arith.constant 1.000000e+00 : f32
    %22 = vector.broadcast %cst_17 : f32 to vector<1x16xf32>
    %23 = arith.addf %22, %21 : vector<1x16xf32>
    %24 = arith.divf %22, %23 : vector<1x16xf32>
    %c0_18 = arith.constant 0 : index
    %c0_19 = arith.constant 0 : index
    %25 = vector.load %arg8[%c0_18, %c0_19] : memref<1x16xf32, #tpu.memory_space<vmem>>, vector<1x16xf32>
    tpu.vector_store %arg8[%c0_18, %c0_19], %24 {strides = array<i32>} : memref<1x16xf32, #tpu.memory_space<vmem>>, vector<1x16xf32>,
    return
  }
  func.func @transform_0(%arg0: i32) -> (i32, i32) {
    %c0_i32 = arith.constant 0 : i32
    %c0_i32_0 = arith.constant 0 : i32
    return %arg0, %c0_i32 : i32, i32
  }
  func.func @transform_1(%arg0: i32) -> (i32, i32) {
    %c0_i32 = arith.constant 0 : i32
    %c0_i32_0 = arith.constant 0 : i32
    %c0_i32_1 = arith.constant 0 : i32
    return %c0_i32, %c0_i32_0 : i32, i32
  }
  func.func @transform_2(%arg0: i32) -> (i32, i32) {
    %c0_i32 = arith.constant 0 : i32
    %c0_i32_0 = arith.constant 0 : i32
    %c0_i32_1 = arith.constant 0 : i32
    return %c0_i32, %c0_i32_0 : i32, i32
  }
  func.func @transform_3(%arg0: i32) -> (i32, i32) {
    %c0_i32 = arith.constant 0 : i32
    %c0_i32_0 = arith.constant 0 : i32
    %c0_i32_1 = arith.constant 0 : i32
    return %c0_i32, %c0_i32_0 : i32, i32
  }
  func.func @transform_4(%arg0: i32) -> (i32, i32) {
    %c0_i32 = arith.constant 0 : i32
    %c0_i32_0 = arith.constant 0 : i32
    %c0_i32_1 = arith.constant 0 : i32
    return %c0_i32, %c0_i32_0 : i32, i32
  }
  func.func @transform_5(%arg0: i32) -> (i32, i32) {
    %c0_i32 = arith.constant 0 : i32
    %c0_i32_0 = arith.constant 0 : i32
    %c0_i32_1 = arith.constant 0 : i32
    return %c0_i32, %c0_i32_0 : i32, i32
  }
  func.func @transform_6(%arg0: i32) -> (i32, i32) {
    %c0_i32 = arith.constant 0 : i32
    %c0_i32_0 = arith.constant 0 : i32
    %c0_i32_1 = arith.constant 0 : i32
    return %c0_i32, %c0_i32_0 : i32, i32
  }
  func.func @transform_7(%arg0: i32) -> (i32, i32) {
    %c0_i32 = arith.constant 0 : i32
    %c0_i32_0 = arith.constant 0 : i32
    return %c0_i32, %arg0 : i32, i32
  }
}

</mosaic_0001>

<bundles_post_ra>
// kernel: ap_generator_forward.1
= control target key start
LH: loop header
LB: loop body
LE: loop exit
PB: predicated region body
PF: predicated region fallthrough
CT: control target
= control target key end

     0   :  { %s652_s0 = inlined_call_operand.vmem [shape: f32[16,16], index: 0, kind: input, shape index: {}]   ;;  %s653_s1 = inlined_call_operand.vmem [shape: f32[32,16], index: 1, kind: input, shape index: {}]   ;;  %s654_s2 = inlined_call_operand.vmem [shape: f32[32,1], index: 2, kind: input, shape index: {}]   ;;  %s655_s3 = inlined_call_operand.vmem [shape: f32[32,32], index: 3, kind: input, shape index: {}]   ;;  %s656_s4 = inlined_call_operand.vmem [shape: f32[32,1], index: 4, kind: input, shape index: {}]   ;;  %s657_s5 = inlined_call_operand.vmem [shape: f32[1,32], index: 5, kind: input, shape index: {}]   ;;  %s658_s6 = inlined_call_operand.<no memory space> [shape: f32[1,1], index: 6, kind: input, shape index: {}]   ;;  %s659_s7 = inlined_call_operand.hbm [shape: f32[1,16], index: 7, kind: output, shape index: {}]  }
   0x1   :  { %v12_v0 = vstv %s658_s6 }
   0x2   :  { %13 = vst [vmem:[#allocation2] sm:$0x1] %v12_v0 }
   0x3   :  { %v29_v1 = vld [vmem:[%s652_s0] sm:$0xff]  ;;  %v30_v2 = vld [vmem:[%s652_s0 + $0x8] sm:$0xff]  ;;  %vm59_vm0 = vcmask 130048   ;;  %v524_v5 = vmov 0   ;;  %v37_v7 = vld [vmem:[%s654_s2 + $0x10] sm:$0xff] }
   0x4   :  { %v31_v3 = vld [vmem:[%s653_s1] sm:$0xff]  ;;  %v469_v4 = vpack.c.bf16 %v30_v2, %v29_v1  ;;  %vm470_vm1 = vmpackc.low %vm59_vm0, %vm59_vm0  ;;  %494 = vset.pattern.permute.xlu0 %v524_v5  ;;  %495 = vset.pattern.permute.xlu1 %v524_v5  ;;  %v36_v8 = vld [vmem:[%s654_s2 + $0x8] sm:$0xff] }
   0x5   :  { %438 = vmatprep.mubr.msk.f32.mxu0 %vm59_vm0, %v31_v3  ;;  %v35_v6 = vld [vmem:[%s654_s2] sm:$0xff]  ;;  %51 = vperm.xlu1 %495, %v37_v7   ;;  %v38_v9 = vld [vmem:[%s654_s2 + $0x18] sm:$0xff] }
   0x6   :  { %471 = vmatprep.subr.msk.bf16.mxu0 %vm470_vm1, %v469_v4  ;;  %41 = vperm.xlu0 %494, %v35_v6  }
   0x7   :  { %474 = vmatpush3.bf16.xpose.msk.msra.mxu0 %vm470_vm1, %v469_v4 }
   0x8   :  { %14 = vsyncpa [#allocation4], 0  ;;  %v32_v10 = vld [vmem:[%s653_s1 + $0x8] sm:$0xff]  ;;  %v171_v11 = vld [vmem:[%s656_s4] sm:$0xff]  ;;  %vm195_vm2 = vcmask 261120   ;;  %v525_v40 = vmov 0.0|0.0   ;;  %v304_v61 = vlaneseq }
   0x9   :  { %56 = vperm.xlu1 %495, %v38_v9   ;;  %v33_v12 = vld [vmem:[%s653_s1 + $0x10] sm:$0xff]  ;;  %v172_v13 = vld [vmem:[%s656_s4 + $0x8] sm:$0xff]  ;;  %v34_v14 = vld [vmem:[%s653_s1 + $0x18] sm:$0xff]  ;;  %483 = vmatprep.subr.bf16.mxu0 %v525_v40  ;;  %vm526_vm3 = vmmov 0   ;;  %v527_v41 = vmov 0.0   ;;  %s528_s10 = smov [#allocation3]  }
   0xa   :  { %46 = vperm.xlu0 %494, %v36_v8   ;;  %v173_v15 = vld [vmem:[%s656_s4 + $0x10] sm:$0xff]  ;;  %v174_v16 = vld [vmem:[%s656_s4 + $0x18] sm:$0xff]  ;;  %v298_v17 = vld [vmem:[#allocation2] sm:$0x1]  ;;  %v305_v62 = vshrl.u32 %v304_v61, 7  ;;  %s395_s11 = sshll.u32 %s528_s10, 4  ;;  %s396_s11 = int_to_ptr.vmem [resolvable:$true] %s395_s11 }
   0xb   :  { %v167_v18 = vld [vmem:[%s655_s3] sm:$0xff]  ;;  %v168_v37 = vld [vmem:[%s655_s3 + $0x8] sm:$0xff]  ;;  %v169_v38 = vld [vmem:[%s655_s3 + $0x10] sm:$0xff]  ;;  %vm387_vm4 = vcmask 122880   ;;  %s504_s12 = scalar_lea.vmem %s396_s11, 32  ;;  %p505_p1 = scmp.lt.s32.totalorder %s396_s11, %s396_s11 }
   0xc   :  { %452 = vmatprep.mubr.msk.f32.mxu1 %vm195_vm2, %v167_v18  ;;  %v170_v39 = vld [vmem:[%s655_s3 + $0x18] sm:$0xff]  ;;  %v297_v60 = vld [vmem:[%s657_s5] sm:$0x1]  ;;  %v306_v63 = vsub.s32 0, %v305_v62  ;;  %s500_s5 = scalar_lea.vmem %s396_s11, 16 }
   0xd   :  { %182 = vperm.xlu1 %495, %v172_v13   ;;  %p501_p0 = scmp.ne.s32.totalorder %s396_s11, %s500_s5  ;;  %p506_p2 = scmp.lt.s32.totalorder %s504_s12, %s500_s5 }
   0xe   :  { %439 = vmatmul.mubr.msk.f32.vlgmr.msra.gmra.mrb[0].mxu0 %vm59_vm0, %v32_v10  ;;  %177 = vperm.xlu0 %494, %v171_v11  }
   0xf   :  { %441 = vmatprep.mubr.msk.f32.mxu0 %vm59_vm0, %v33_v12  ;;  %p507_p3 = por %p506_p2, %p505_p1 }
  0x11   :  { %192 = vperm.xlu1 %495, %v174_v16   ;;  %p508_p4 = pnand %p507_p3, %p501_p0 }
  0x12   :  { %442 = vmatmul.mubr.msk.f32.gmra.mrb[2].mxu0 %vm59_vm0, %v34_v14  ;;  %187 = vperm.xlu0 %494, %v173_v15  }
  0x13   :  { %466 = vmatprep.mubr.msk.f32.mxu0 %vm526_vm3, %v527_v41 }
  0x16   :  { %301 = vperm.xlu0 %494, %v298_v17  }
  0x84   :  { %v52_v20 = vpop.permute.xlu1 %51 }
  0x85   :  { %v42_v19 = vpop.permute.xlu0 %41 }
  0x88   :  { %v57_v27 = vpop.permute.xlu1 %56 }
  0x89   :  { %v47_v21 = vpop.permute.xlu0 %46 }
  0x8c   :  { %v183_v42 = vpop.permute.xlu1 %182 }
  0x8d   :  { %v178_v43 = vpop.permute.xlu0 %177 }
  0x90   :  { %v193_v49 = vpop.permute.xlu1 %192 }
  0x91   :  { %v188_v52 = vpop.permute.xlu0 %187 }
  0x95   :  { %v302_v0 = vpop.permute.xlu0 %301 }
  0x96   :  { %v307_v1 = vrot.slane %v302_v0, %v306_v63 }
  0xe1   :  { %v440_v22 = vpop.f32.mrb[0].mxu0 }
  0xe2   :  { %v150_v23 = vadd.f32 %v440_v22, %v47_v21  ;;  %v144_v24 = vpop.f32.mrb[1].mxu0 }
  0xe3   :  { %v145_v25 = vadd.f32 %v144_v24, %v42_v19 }
  0xe4   :  { %v164_v26 = vmax.f32 %v150_v23, 0.0 }
  0xe5   :  { %v163_v28 = vmax.f32 %v145_v25, 0.0  ;;  %v443_v29 = vpop.f32.mrb[2].mxu0 }
  0xe6   :  { %v160_v30 = vadd.f32 %v443_v29, %v57_v27  ;;  %v154_v31 = vpop.f32.mrb[3].mxu0 }
  0xe7   :  { %v155_v32 = vadd.f32 %v154_v31, %v52_v20  ;;  %v475_v33 = vpack.c.bf16 %v164_v26, %v163_v28 }
  0xe8   :  { %v166_v34 = vmax.f32 %v160_v30, 0.0 }
  0xe9   :  { %v165_v35 = vmax.f32 %v155_v32, 0.0  ;;  %476 = vmatprep.subr.bf16.mxu1 %v475_v33 }
  0xea   :  { %478 = vmatpush3.bf16.msra.mxu1 %v475_v33 }
  0xeb   :  { %v479_v36 = vpack.c.bf16 %v166_v34, %v165_v35 }
  0xed   :  { %480 = vmatprep.subr.bf16.mxu1 %v479_v36 }
  0xee   :  { %482 = vmatpush3.bf16.msra.mxu1 %v479_v36 }
  0xf1   :  { %453 = vmatmul.mubr.msk.f32.vlgmr.msra.gmra.mrb[0].mxu1 %vm195_vm2, %v168_v37 }
  0xf2   :  { %455 = vmatprep.mubr.msk.f32.mxu1 %vm195_vm2, %v169_v38 }
  0xf5   :  { %456 = vmatmul.mubr.msk.f32.gmra.mrb[2].mxu1 %vm195_vm2, %v170_v39 }
 0x1c4   :  { %v454_v44 = vpop.f32.mrb[0].mxu1 }
 0x1c5   :  { %v280_v45 = vadd.f32 %v454_v44, %v183_v42  ;;  %v274_v46 = vpop.f32.mrb[1].mxu1 }
 0x1c6   :  { %v275_v47 = vadd.f32 %v274_v46, %v178_v43 }
 0x1c7   :  { %v294_v48 = vmax.f32 %v280_v45, 0.0 }
 0x1c8   :  { %v293_v50 = vmax.f32 %v275_v47, 0.0  ;;  %v457_v51 = vpop.f32.mrb[2].mxu1 }
 0x1c9   :  { %v290_v53 = vadd.f32 %v457_v51, %v193_v49  ;;  %v284_v54 = vpop.f32.mrb[3].mxu1 }
 0x1ca   :  { %v484_v55 = vpack.c.bf16 %v294_v48, %v293_v50  ;;  %v285_v56 = vadd.f32 %v284_v54, %v188_v52 }
 0x1cb   :  { %v296_v57 = vmax.f32 %v290_v53, 0.0 }
 0x1cc   :  { %v295_v58 = vmax.f32 %v285_v56, 0.0  ;;  %485 = vmatpush3.bf16.msra.mxu0 %v484_v55 }
 0x1cd   :  { %486 = vmatprep.subr.bf16.mxu0 %v525_v40 }
 0x1ce   :  { %v487_v59 = vpack.c.bf16 %v296_v57, %v295_v58 }
 0x1d0   :  { %488 = vmatpush3.bf16.msra.mxu0 %v487_v59 }
 0x1d3   :  { %467 = vmatmul.mubr.msk.f32.vlgmr.msra.gmra.mrb[4].mxu0 %vm195_vm2, %v297_v60 }
 0x2a6   :  { %v377_v2 = vpop.f32.mrb[4].mxu0 }
 0x2a7   :  { %v378_v3 = vadd.f32 %v377_v2, %v307_v1  ;;  %v468_v4 = vpop.f32.mrb[5].mxu0 }
 0x2a9   :  { %v414_v5 = vmul.f32 -1.442695, %v378_v3 }
 0x2ab   :  { %496 = vpow2.f32 %v414_v5 }
 0x2b5   :  { %v497_v6 = vpop.eup %496 }
 0x2b6   :  { %v384_v7 = vadd.f32 1.0, %v497_v6 }
 0x2b8   :  { %498 = vrcp.f32 %v384_v7 }
 0x2c2   :  { %v499_v8 = vpop.eup %498 }
 0x2c3   :  { %388 = vst.msk [vmem:[#allocation3] sm:$0x1] %vm387_vm4, %v499_v8 }
 0x2c4   :  { %511 = shalt.err (!%p508_p4)
}
 0x2c5   :  { %s512_s15 = scalar_lea.hbm %s659_s7, 16 }
 0x2c6   :  { %p513_p5 = scmp.ne.s32.totalorder %s659_s7, %s512_s15  ;;  %p516_p6 = scmp.lt.u32.totalorder %s512_s15, %s659_s7 }
 0x2c8   :  { %p518_p7 = pnand %p516_p6, %p513_p5 }
 0x2ca   :  { %521 = shalt.err (!%p518_p7)
}
 0x2cb   :  { %398 = dma.vmem_to_hbm [thread:$0]  %s396_s11, 16, %s659_s7, [#allocation4]  }
 0x2cc   :  { %522 = dma.done.wait [#allocation4], 16  }
 0x2cd   :  { %523 = vsyncadd [#allocation4], 4294967280 }
 0x2ce   :  { %402 = vsyncpa [#allocation4], 1 }

</bundles_post_ra>
